<compile_context>
chip_gen: v6e
topology: v6e:2x2x1
jax: 0.10.0
libtpu: 0.0.40
codegen_flags: <defaults>
</compile_context>

<pallas_src>
import jax
import jax.numpy as jnp
from jax.experimental import pallas as pl
from jax.experimental.pallas import tpu as pltpu

INPUT_SIZE = 40          # hard-coded inside the PyTorch module (nn.LSTM(input_size=40, ...))
HIDDEN_SIZE = 32
OUTPUT_SIZE = 16

GATE_PAD = 128           # 3*H = 96 padded to a full lane group
OUT_PAD = 128            # O = 16 padded to a full lane group
NEG_PAD = -1e30          # logit bias for padded output lanes (exp -> 0 exactly)


def _round_up(n, m):
    return ((n + m - 1) // m) * m


def _lstm_kernel(x_ref, w_ref, b_ref, wd_ref, bd_ref, out_ref):
    H = HIDDEN_SIZE

    # Fused packed gate matmul (i | g | o), forget gate dropped (c0 == 0).
    # (tm, 40) bf16  x  (40, 128) bf16  ->  (tm, 128) f32 on the MXU.
    gates = jnp.dot(x_ref[...], w_ref[...],
                    preferred_element_type=jnp.float32) + b_ref[...]

    # Single EUP pass over the packed gates. The g-columns of W/b were
    # pre-scaled by 2 at pack time, so tanh(g_pre) == 2*sigmoid(2*g_pre) - 1.
    sg = jax.nn.sigmoid(gates)
    i_g = sg[:, 0 * H:1 * H]
    g_g = 2.0 * sg[:, 1 * H:2 * H] - 1.0
    o_g = sg[:, 2 * H:3 * H]

    c = i_g * g_g                          # f * c0 == 0 exactly
    h = o_g * jnp.tanh(c)                  # (tm, H) f32

    # Dense layer: (tm, 32) bf16 x (32, 128) bf16 -> (tm, 128) f32.
    y = jnp.dot(h.astype(jnp.bfloat16), wd_ref[...],
                preferred_element_type=jnp.float32) + bd_ref[...]

    # Stable log-softmax over dim 1; padded lanes carry -1e30 logits -> exp == 0,
    # so they contribute nothing to the reduction.
    m = jnp.max(y, axis=1, keepdims=True)
    z = y - m
    lse = jnp.log(jnp.sum(jnp.exp(z), axis=1, keepdims=True))
    out_ref[...] = z - lse


def pack_params(params):
    """One-time packing of PyTorch-layout parameters (hoisted out of hot path).

    PyTorch gate order in w_ih / biases is [i, f, g, o]; f is dropped (c0 == 0),
    g-columns are pre-scaled by 2 for the tanh-via-sigmoid trick, everything is
    lane-padded to 128 and matmul operands are cast to bf16.
    """
    (w_ih, w_hh, b_ih, b_hh, w_dense, b_dense) = params
    H, O, I = HIDDEN_SIZE, OUTPUT_SIZE, INPUT_SIZE

    w_ih_t = w_ih.T.astype(jnp.float32)                       # (40, 4H)
    b = (b_ih + b_hh).astype(jnp.float32).reshape(1, 4 * H)   # (1, 4H)

    w_i, w_g, w_o = w_ih_t[:, 0:H], w_ih_t[:, 2 * H:3 * H], w_ih_t[:, 3 * H:4 * H]
    b_i, b_g, b_o = b[:, 0:H], b[:, 2 * H:3 * H], b[:, 3 * H:4 * H]

    w_gates = jnp.zeros((I, GATE_PAD), jnp.float32)
    w_gates = w_gates.at[:, 0 * H:1 * H].set(w_i)
    w_gates = w_gates.at[:, 1 * H:2 * H].set(2.0 * w_g)       # tanh(x) = 2*sigmoid(2x) - 1
    w_gates = w_gates.at[:, 2 * H:3 * H].set(w_o)

    b_gates = jnp.zeros((1, GATE_PAD), jnp.float32)
    b_gates = b_gates.at[:, 0 * H:1 * H].set(b_i)
    b_gates = b_gates.at[:, 1 * H:2 * H].set(2.0 * b_g)
    b_gates = b_gates.at[:, 2 * H:3 * H].set(b_o)

    wd = jnp.zeros((H, OUT_PAD), jnp.float32)
    wd = wd.at[:, :O].set(w_dense.T.astype(jnp.float32))
    bd = jnp.full((1, OUT_PAD), NEG_PAD, jnp.float32)
    bd = bd.at[:, :O].set(b_dense.astype(jnp.float32).reshape(1, O))

    return (w_gates.astype(jnp.bfloat16), b_gates,
            wd.astype(jnp.bfloat16), bd)


def lstm_forward(x, packed_params, *, tm=128):
    """Run the module forward for one or many independent 40-element inputs.

    x: any array whose trailing elements reshape to (B, 40); each row mirrors one
    PyTorch call `forward(input.view(1, 1, -1))`. Returns (B, 16) log-probs.
    """
    x2 = jnp.asarray(x).reshape(-1, INPUT_SIZE).astype(jnp.float32)
    B = x2.shape[0]

    # Row tile: up to 128, multiple of 16 (bf16 sublane packing), no bigger than B.
    tm = min(tm, _round_up(B, 16))
    B_pad = _round_up(B, tm)
    if B_pad != B:
        x2 = jnp.pad(x2, ((0, B_pad - B), (0, 0)))
    x_bf = x2.astype(jnp.bfloat16)

    w_gates, b_gates, wd, bd = packed_params
    grid = (B_pad // tm,)

    out = pl.pallas_call(
        _lstm_kernel,
        out_shape=jax.ShapeDtypeStruct((B_pad, OUT_PAD), jnp.float32),
        grid_spec=pltpu.PrefetchScalarGridSpec(
            num_scalar_prefetch=0,
            grid=grid,
            in_specs=[
                # x tiled along the batch axis
                pl.BlockSpec((tm, INPUT_SIZE), lambda i: (i, 0)),
                # weights / biases: constant index_map -> fetched once, VMEM-resident
                pl.BlockSpec((INPUT_SIZE, GATE_PAD), lambda i: (0, 0)),
                pl.BlockSpec((1, GATE_PAD), lambda i: (0, 0)),
                pl.BlockSpec((HIDDEN_SIZE, OUT_PAD), lambda i: (0, 0)),
                pl.BlockSpec((1, OUT_PAD), lambda i: (0, 0)),
            ],
            out_specs=pl.BlockSpec((tm, OUT_PAD), lambda i: (i, 0)),
        ),
        compiler_params=pltpu.CompilerParams(
            dimension_semantics=("parallel",)),   # batch axis splits across v7x TCs
    )(x_bf, w_gates, b_gates, wd, bd)

    return out[:B, :OUTPUT_SIZE]


def _make_params(key):
    """Deterministic synthetic parameters with PyTorch-default-style init."""
    H, O, I = HIDDEN_SIZE, OUTPUT_SIZE, INPUT_SIZE
    k = jax.random.split(key, 6)
    s = 1.0 / jnp.sqrt(H)
    w_ih = jax.random.uniform(k[0], (4 * H, I), jnp.float32, -s, s)
    w_hh = jax.random.uniform(k[1], (4 * H, H), jnp.float32, -s, s)
    b_ih = jax.random.uniform(k[2], (4 * H,), jnp.float32, -s, s)
    b_hh = jax.random.uniform(k[3], (4 * H,), jnp.float32, -s, s)
    w_dense = jax.random.uniform(k[4], (O, H), jnp.float32, -s, s)
    b_dense = jax.random.uniform(k[5], (O,), jnp.float32, -s, s)
    return (w_ih, w_hh, b_ih, b_hh, w_dense, b_dense)


def _reference_exact(x, params):
    """Pure-JAX f32 reference mirroring the PyTorch forward exactly (per row)."""
    (w_ih, w_hh, b_ih, b_hh, w_dense, b_dense) = params
    xb = jnp.asarray(x).reshape(-1, INPUT_SIZE).astype(jnp.float32)
    gates = xb @ w_ih.T + b_ih + b_hh                     # h0 == 0
    i, f, g, o = jnp.split(gates, 4, axis=1)
    i, f, o = jax.nn.sigmoid(i), jax.nn.sigmoid(f), jax.nn.sigmoid(o)
    g = jnp.tanh(g)
    c = i * g                                             # f * c0 == 0
    h = o * jnp.tanh(c)
    y = h @ w_dense.T + b_dense
    return jax.nn.log_softmax(y, axis=1)


def _reference_matched(x, packed_params):
    """Plain-JAX computation matching the kernel's bf16-matmul arithmetic."""
    w_gates, b_gates, wd, bd = packed_params
    H = HIDDEN_SIZE
    xb = jnp.asarray(x).reshape(-1, INPUT_SIZE).astype(jnp.bfloat16)
    gates = jnp.dot(xb, w_gates, preferred_element_type=jnp.float32) + b_gates
    sg = jax.nn.sigmoid(gates)
    i_g = sg[:, 0:H]
    g_g = 2.0 * sg[:, H:2 * H] - 1.0
    o_g = sg[:, 2 * H:3 * H]
    c = i_g * g_g
    h = o_g * jnp.tanh(c)
    y = jnp.dot(h.astype(jnp.bfloat16), wd, preferred_element_type=jnp.float32) + bd
    return jax.nn.log_softmax(y, axis=1)[:, :OUTPUT_SIZE]


if __name__ == "__main__":
    key = jax.random.PRNGKey(0)
    pkey, xkey = jax.random.split(key)
    params = _make_params(pkey)
    packed = pack_params(params)          # one-time packing, outside the hot path

    # A small batch of independent inputs; each row mirrors one module forward call.
    B = 8
    x_batch = jax.random.normal(xkey, (B, INPUT_SIZE), jnp.float32)

    out = jax.block_until_ready(lstm_forward(x_batch, packed))
    assert out.shape == (B, OUTPUT_SIZE)

    # Tight check: kernel reproduces the intended (bf16-matmul) computation.
    ref_bf16 = _reference_matched(x_batch, packed)
    assert jnp.allclose(out, ref_bf16, atol=5e-3, rtol=1e-3), "mismatch vs matched ref"

    # Loose check: kernel matches the exact f32 PyTorch-semantics reference to
    # within bf16-matmul error.
    ref_f32 = _reference_exact(x_batch, params)
    assert jnp.allclose(out, ref_f32, atol=1e-1, rtol=1e-2), "mismatch vs exact ref"

    # Single-input path (original module semantics: one (1, 16) log-prob row).
    single = jax.block_until_ready(lstm_forward(x_batch[0].reshape(8, 5), packed))
    assert single.shape == (1, OUTPUT_SIZE)
    assert jnp.allclose(single, out[0:1], atol=1e-5, rtol=1e-5), "single vs batched mismatch"

    print("KERNEL_OK")
</pallas_src>

<mosaic_0001>
module attributes {stable_mosaic.version = 11 : i64} {
  func.func @_lstm_kernel(%arg0: i32, %arg1: memref<16x40xbf16, #tpu.memory_space<vmem>>, %arg2: memref<40x128xbf16, #tpu.memory_space<vmem>>, %arg3: memref<1x128xf32, #tpu.memory_space<vmem>>, %arg4: memref<32x128xbf16, #tpu.memory_space<vmem>>, %arg5: memref<1x128xf32, #tpu.memory_space<vmem>>, %arg6: memref<16x128xf32, #tpu.memory_space<vmem>>) attributes {dimension_semantics = [#tpu.dimension_semantics<parallel>], iteration_bounds = array<i64: 1>, scalar_prefetch = 0 : i64, scratch_operands = 0 : i64, tpu.core_type = #tpu.core_type<tc>, window_params = [{transform_indices = @transform_0, window_bounds = array<i64: 16, 40>}, {pipeline_mode = #tpu.pipeline_mode<synchronous>, transform_indices = @transform_1, window_bounds = array<i64: 40, 128>}, {pipeline_mode = #tpu.pipeline_mode<synchronous>, transform_indices = @transform_2, window_bounds = array<i64: 1, 128>}, {pipeline_mode = #tpu.pipeline_mode<synchronous>, transform_indices = @transform_3, window_bounds = array<i64: 32, 128>}, {pipeline_mode = #tpu.pipeline_mode<synchronous>, transform_indices = @transform_4, window_bounds = array<i64: 1, 128>}, {transform_indices = @transform_5, window_bounds = array<i64: 16, 128>}]} {
    %c0 = arith.constant 0 : index
    %c0_0 = arith.constant 0 : index
    %0 = vector.load %arg1[%c0, %c0_0] : memref<16x40xbf16, #tpu.memory_space<vmem>>, vector<16x40xbf16>
    %c0_1 = arith.constant 0 : index
    %c0_2 = arith.constant 0 : index
    %1 = vector.load %arg2[%c0_1, %c0_2] : memref<40x128xbf16, #tpu.memory_space<vmem>>, vector<40x128xbf16>
    %cst = arith.constant dense<0.000000e+00> : vector<16x128xf32>
    %2 = tpu.matmul %0, %1, %cst {dimension_numbers = #tpu.dot_dimension_numbers<[1], [0], [0], [1], [0, 0, 1, 1], [], []>} : vector<16x40xbf16>, vector<40x128xbf16>, vector<16x128xf32> -> vector<16x128xf32>
    %c0_3 = arith.constant 0 : index
    %c0_4 = arith.constant 0 : index
    %3 = vector.load %arg3[%c0_3, %c0_4] : memref<1x128xf32, #tpu.memory_space<vmem>>, vector<1x128xf32>
    %4 = vector.broadcast %3 : vector<1x128xf32> to vector<16x128xf32>
    %5 = arith.addf %2, %4 : vector<16x128xf32>
    %6 = arith.negf %5 : vector<16x128xf32>
    %7 = math.exp %6 : vector<16x128xf32>
    %cst_5 = arith.constant 1.000000e+00 : f32
    %8 = vector.broadcast %cst_5 : f32 to vector<16x128xf32>
    %9 = arith.addf %8, %7 : vector<16x128xf32>
    %10 = arith.divf %8, %9 : vector<16x128xf32>
    %11 = vector.extract_strided_slice %10 {offsets = [0, 0], sizes = [16, 32], strides = [1, 1]} : vector<16x128xf32> to vector<16x32xf32>
    %12 = vector.extract_strided_slice %10 {offsets = [0, 32], sizes = [16, 32], strides = [1, 1]} : vector<16x128xf32> to vector<16x32xf32>
    %cst_6 = arith.constant 2.000000e+00 : f32
    %13 = vector.broadcast %cst_6 : f32 to vector<16x32xf32>
    %14 = arith.mulf %13, %12 : vector<16x32xf32>
    %cst_7 = arith.constant 1.000000e+00 : f32
    %15 = vector.broadcast %cst_7 : f32 to vector<16x32xf32>
    %16 = arith.subf %14, %15 : vector<16x32xf32>
    %17 = vector.extract_strided_slice %10 {offsets = [0, 64], sizes = [16, 32], strides = [1, 1]} : vector<16x128xf32> to vector<16x32xf32>
    %18 = arith.mulf %11, %16 : vector<16x32xf32>
    %19 = math.tanh %18 : vector<16x32xf32>
    %20 = arith.mulf %17, %19 : vector<16x32xf32>
    %21 = arith.truncf %20 : vector<16x32xf32> to vector<16x32xbf16>
    %c0_8 = arith.constant 0 : index
    %c0_9 = arith.constant 0 : index
    %22 = vector.load %arg4[%c0_8, %c0_9] : memref<32x128xbf16, #tpu.memory_space<vmem>>, vector<32x128xbf16>
    %cst_10 = arith.constant dense<0.000000e+00> : vector<16x128xf32>
    %23 = tpu.matmul %21, %22, %cst_10 {dimension_numbers = #tpu.dot_dimension_numbers<[1], [0], [0], [1], [0, 0, 1, 1], [], []>} : vector<16x32xbf16>, vector<32x128xbf16>, vector<16x128xf32> -> vector<16x128xf32>
    %c0_11 = arith.constant 0 : index
    %c0_12 = arith.constant 0 : index
    %24 = vector.load %arg5[%c0_11, %c0_12] : memref<1x128xf32, #tpu.memory_space<vmem>>, vector<1x128xf32>
    %25 = vector.broadcast %24 : vector<1x128xf32> to vector<16x128xf32>
    %26 = arith.addf %23, %25 : vector<16x128xf32>
    %cst_13 = arith.constant dense<0xFF800000> : vector<16xf32>
    %27 = vector.multi_reduction <maximumf>, %26, %cst_13 [1] : vector<16x128xf32> to vector<16xf32>
    %28 = vector.shape_cast %27 : vector<16xf32> to vector<16x1xf32>
    %29 = vector.broadcast %28 : vector<16x1xf32> to vector<16x128xf32>
    %30 = arith.subf %26, %29 : vector<16x128xf32>
    %31 = math.exp %30 : vector<16x128xf32>
    %cst_14 = arith.constant dense<0.000000e+00> : vector<16xf32>
    %32 = vector.multi_reduction <add>, %31, %cst_14 [1] : vector<16x128xf32> to vector<16xf32>
    %33 = vector.shape_cast %32 : vector<16xf32> to vector<16x1xf32>
    %34 = math.log %33 : vector<16x1xf32>
    %35 = vector.broadcast %34 : vector<16x1xf32> to vector<16x128xf32>
    %36 = arith.subf %30, %35 : vector<16x128xf32>
    %c0_15 = arith.constant 0 : index
    %c0_16 = arith.constant 0 : index
    %37 = vector.load %arg6[%c0_15, %c0_16] : memref<16x128xf32, #tpu.memory_space<vmem>>, vector<16x128xf32>
    tpu.vector_store %arg6[%c0_15, %c0_16], %36 {strides = array<i32>} : memref<16x128xf32, #tpu.memory_space<vmem>>, vector<16x128xf32>,
    return
  }
  func.func @transform_0(%arg0: i32) -> (i32, i32) {
    %c0_i32 = arith.constant 0 : i32
    %c0_i32_0 = arith.constant 0 : i32
    return %arg0, %c0_i32 : i32, i32
  }
  func.func @transform_1(%arg0: i32) -> (i32, i32) {
    %c0_i32 = arith.constant 0 : i32
    %c0_i32_0 = arith.constant 0 : i32
    %c0_i32_1 = arith.constant 0 : i32
    return %c0_i32, %c0_i32_0 : i32, i32
  }
  func.func @transform_2(%arg0: i32) -> (i32, i32) {
    %c0_i32 = arith.constant 0 : i32
    %c0_i32_0 = arith.constant 0 : i32
    %c0_i32_1 = arith.constant 0 : i32
    return %c0_i32, %c0_i32_0 : i32, i32
  }
  func.func @transform_3(%arg0: i32) -> (i32, i32) {
    %c0_i32 = arith.constant 0 : i32
    %c0_i32_0 = arith.constant 0 : i32
    %c0_i32_1 = arith.constant 0 : i32
    return %c0_i32, %c0_i32_0 : i32, i32
  }
  func.func @transform_4(%arg0: i32) -> (i32, i32) {
    %c0_i32 = arith.constant 0 : i32
    %c0_i32_0 = arith.constant 0 : i32
    %c0_i32_1 = arith.constant 0 : i32
    return %c0_i32, %c0_i32_0 : i32, i32
  }
  func.func @transform_5(%arg0: i32) -> (i32, i32) {
    %c0_i32 = arith.constant 0 : i32
    %c0_i32_0 = arith.constant 0 : i32
    return %arg0, %c0_i32 : i32, i32
  }
}

</mosaic_0001>

<bundles_post_ra>
// kernel: tpu_custom_call.1
= control target key start
LH: loop header
LB: loop body
LE: loop exit
PB: predicated region body
PF: predicated region fallthrough
CT: control target
= control target key end

     0   :  { %10 = vsyncpa [#allocation3], 0  ;;  %s526_s0 = inlined_call_operand.hbm [shape: bf16[16,40], index: 0, kind: input, shape index: {}]   ;;  %s527_s1 = inlined_call_operand.hbm [shape: bf16[40,128], index: 1, kind: input, shape index: {}]   ;;  %s528_s2 = inlined_call_operand.vmem [shape: f32[1,128], index: 2, kind: input, shape index: {}]   ;;  %s529_s3 = inlined_call_operand.hbm [shape: bf16[32,128], index: 3, kind: input, shape index: {}]   ;;  %s530_s4 = inlined_call_operand.vmem [shape: f32[1,128], index: 4, kind: input, shape index: {}]   ;;  %s531_s5 = inlined_call_operand.hbm [shape: f32[16,128], index: 5, kind: output, shape index: {}]  }
   0x1   :  { %11 = vsyncpa [#allocation6], 0 }
   0x2   :  { %12 = vsyncpa [#allocation4], 0  ;;  %s458_s18 = smov [#allocation5]   ;;  %s459_s20 = smov [#allocation2]  }
   0x3   :  { %s30_s19 = sshll.u32 %s458_s18, 4  ;;  %s18_s21 = sshll.u32 %s459_s20, 4  ;;  %s31_s19 = int_to_ptr.vmem [resolvable:$true] %s30_s19  ;;  %s19_s21 = int_to_ptr.vmem [resolvable:$true] %s18_s21 }
   0x4   :  { %s380_s22 = scalar_lea.vmem %s31_s19, 320  ;;  %p385_p1 = scmp.lt.s32.totalorder %s31_s19, %s31_s19 }
   0x5   :  { %p381_p0 = scmp.ne.s32.totalorder %s31_s19, %s380_s22  ;;  %p386_p2 = scmp.lt.s32.totalorder %s380_s22, %s380_s22 }
   0x7   :  { %p387_p3 = por %p386_p2, %p385_p1 }
   0x9   :  { %p388_p4 = pnand %p387_p3, %p381_p0 }
   0xb   :  { %391 = shalt.err (!%p388_p4)
}
   0xc   :  { %s460_s23 = smov 64   ;;  %s461_s24 = smov 4  }
   0xd   :  { %36 = dma.hbm_to_vmem [thread:$0]  %s527_s1, 320, %s31_s19, [#allocation6], %s460_s23, %s460_s23, %s461_s24  }
   0xe   :  { %s400_s27 = scalar_lea.vmem %s19_s21, 128  ;;  %p405_p6 = scmp.lt.s32.totalorder %s19_s21, %s19_s21 }
   0xf   :  { %p401_p5 = scmp.ne.s32.totalorder %s19_s21, %s400_s27  ;;  %p406_p7 = scmp.lt.s32.totalorder %s400_s27, %s400_s27 }
  0x11   :  { %p407_p8 = por %p406_p7, %p405_p6 }
  0x13   :  { %p408_p9 = pnand %p407_p8, %p401_p5 }
  0x15   :  { %411 = shalt.err (!%p408_p9)
}
  0x16   :  { %24 = dma.hbm_to_vmem [thread:$0]  %s526_s0, 128, %s19_s21, [#allocation3], %s460_s23, %s460_s23, %s461_s24  }
  0x17   :  { %s462_s30 = smov [#allocation7]  }
  0x18   :  { %s44_s6 = sshll.u32 %s462_s30, 4  ;;  %s45_s6 = int_to_ptr.vmem [resolvable:$true] %s44_s6 }
  0x19   :  { %s420_s7 = scalar_lea.vmem %s45_s6, 256  ;;  %p425_p11 = scmp.lt.s32.totalorder %s45_s6, %s45_s6 }
  0x1a   :  { %p421_p10 = scmp.ne.s32.totalorder %s45_s6, %s420_s7  ;;  %p426_p12 = scmp.lt.s32.totalorder %s420_s7, %s420_s7 }
  0x1c   :  { %p427_p13 = por %p426_p12, %p425_p11 }
  0x1e   :  { %p428_p0 = pnand %p427_p13, %p421_p10 }
  0x20   :  { %431 = shalt.err (!%p428_p0)
}
  0x21   :  { %50 = dma.hbm_to_vmem [thread:$0]  %s529_s3, 256, %s45_s6, [#allocation6], %s460_s23, %s460_s23, %s461_s24  }
  0x22   :  { %452 = dma.done.wait [#allocation3], 128  }
  0x23   :  { %453 = vsyncadd [#allocation3], 4294967168 }
  0x24   :  { %454 = dma.done.wait [#allocation6], 576  }
  0x25   :  { %455 = vsyncadd [#allocation6], 4294966720  ;;  %v463_v0 = vmov 0.0   ;;  %vm464_vm0 = vmmov 0   ;;  %vm101_vm1 = vcmask 1043456   ;;  %v347_v3 = vld [vmem:[#allocation5 + $0x8] sm:$0xff]  }
  0x26   :  { %317 = vmatprep.subr.bf16.mxu0 %v463_v0  ;;  %323 = vmatprep.mubr.msk.bf16.mxu0 %vm464_vm0, %v463_v0  ;;  %v346_v1 = vld [vmem:[#allocation5 + $0x10] ss:$0 sps:$4 sm:$0xff]   ;;  %v348_v4 = vld [vmem:[#allocation5] sm:$0xff]   ;;  %v349_v5 = vld [vmem:[#allocation2] sm:$0xff]   ;;  %vm97_vm2 = vcmask 326656   ;;  %vm211_vm3 = vcmask 261120  }
  0x27   :  { %327 = vmatprep.subr.bf16.mxu1 %v463_v0  ;;  %331 = vmatprep.mubr.msk.bf16.mxu1 %vm464_vm0, %v463_v0  ;;  %v103_v2 = vsel %vm101_vm1, %v346_v1, 0  ;;  %v296_v6 = vld [vmem:[%s528_s2] ss:$0 sm:$0xff]  ;;  %s465_s2 = smov 96   ;;  %v350_v29 = vld [vmem:[#allocation7 + $0x8] sm:$0xff]  }
  0x28   :  { %318 = vmatpush3.bf16.msra.mxu0 %v103_v2  ;;  %328 = vmatpush3.bf16.msra.mxu1 %v350_v29  ;;  %v351_v30 = vld [vmem:[#allocation7] sm:$0xff]  }
  0x29   :  { %319 = vmatprep.subr.bf16.mxu0 %v463_v0  ;;  %329 = vmatprep.subr.bf16.mxu1 %v463_v0  ;;  %v306_v39 = vld [vmem:[%s530_s4] ss:$0 sm:$0xff]  ;;  %s466_s4 = smov [#allocation8]  }
  0x2a   :  { %s283_s11 = sshll.u32 %s466_s4, 4  ;;  %s284_s11 = int_to_ptr.vmem [resolvable:$true] %s283_s11 }
  0x2b   :  { %s432_s12 = scalar_lea.vmem %s284_s11, 256  ;;  %p437_p2 = scmp.lt.s32.totalorder %s284_s11, %s284_s11 }
  0x2c   :  { %320 = vmatpush3.bf16.msra.mxu0 %v347_v3  ;;  %330 = vmatpush3.bf16.msra.mxu1 %v351_v30  ;;  %p433_p1 = scmp.ne.s32.totalorder %s284_s11, %s432_s12  ;;  %p438_p3 = scmp.lt.s32.totalorder %s432_s12, %s432_s12 }
  0x2d   :  { %321 = vmatprep.subr.bf16.mxu0 %v463_v0 }
  0x2e   :  { %p439_p4 = por %p438_p3, %p437_p2 }
  0x30   :  { %322 = vmatpush3.bf16.msra.mxu0 %v348_v4  ;;  %p440_p5 = pnand %p439_p4, %p433_p1 }
  0x33   :  { %324 = vmatmul.mubr.msk.bf16.vlgmr.msra.gmra.mxu0 %vm97_vm2, %v349_v5 }
  0xf3   :  { %v139_v7 = vpop.f32.mrf.mxu0 }
  0xf4   :  { %v140_v8 = vadd.f32 %v296_v6, %v139_v7 }
  0xf5   :  { %v325_v9 = vpop.f32.mrf.mxu0 }
  0xf6   :  { %v302_v10 = vmul.f32 -1.442695, %v140_v8 }
  0xf7   :  { %v142_v11 = vpop.f32.mrf.mxu0 }
  0xf8   :  { %352 = vpow2.f32 %v302_v10  ;;  %v143_v12 = vadd.f32 %v296_v6, %v142_v11 }
  0xf9   :  { %v326_v13 = vpop.f32.mrf.mxu0 }
  0xfa   :  { %v303_v14 = vmul.f32 -1.442695, %v143_v12 }
  0xfc   :  { %354 = vpow2.f32 %v303_v14 }
 0x105   :  { %v353_v15 = vpop.eup %352 }
 0x106   :  { %v152_v16 = vadd.f32 1.0, %v353_v15 }
 0x108   :  { %356 = vrcp.f32 %v152_v16 }
 0x109   :  { %v355_v17 = vpop.eup %354 }
 0x10a   :  { %v153_v18 = vadd.f32 1.0, %v355_v17 }
 0x10c   :  { %358 = vrcp.f32 %v153_v18 }
 0x115   :  { %v357_v19 = vpop.eup %356 }
 0x116   :  { %v158_v20 = vmul.f32 2.0, %v357_v19 }
 0x118   :  { %v304_v21 = vadd.f32 -1.0, %v158_v20 }
 0x119   :  { %v359_v22 = vpop.eup %358 }
 0x11a   :  { %164 = vrot.lane.b32.xlu0 %v304_v21, %s465_s2  ;;  %v159_v23 = vmul.f32 2.0, %v359_v22 }
 0x11c   :  { %v305_v24 = vadd.f32 -1.0, %v159_v23 }
 0x11e   :  { %166 = vrot.lane.b32.xlu0 %v305_v24, %s465_s2 }
 0x18c   :  { %v165_v25 = vpop.permute.xlu0 %164 }
 0x18d   :  { %v170_v26 = vmul.f32 %v357_v19, %v165_v25 }
 0x18f   :  { %360 = vtanh.f32 %v170_v26 }
 0x190   :  { %v167_v27 = vpop.permute.xlu0 %166 }
 0x191   :  { %v171_v28 = vmul.f32 %v359_v22, %v167_v27 }
 0x193   :  { %362 = vtanh.f32 %v171_v28 }
 0x19c   :  { %v361_v31 = vpop.eup %360 }
 0x19d   :  { %176 = vrot.lane.b32.xlu1 %v361_v31, %s460_s23 }
 0x1a0   :  { %v363_v32 = vpop.eup %362 }
 0x1a1   :  { %178 = vrot.lane.b32.xlu1 %v363_v32, %s460_s23 }
 0x20f   :  { %v177_v33 = vpop.permute.xlu1 %176 }
 0x210   :  { %v182_v35 = vmul.f32 %v357_v19, %v177_v33 }
 0x213   :  { %v179_v34 = vpop.permute.xlu1 %178 }
 0x214   :  { %v183_v36 = vmul.f32 %v359_v22, %v179_v34 }
 0x216   :  { %v184_v37 = vpack.c.bf16 %v183_v36, %v182_v35 }
 0x218   :  { %197 = vrot.lane.b32.xlu0 %v184_v37, %s460_s23 }
 0x28a   :  { %v198_v38 = vpop.permute.xlu0 %197 }
 0x28b   :  { %332 = vmatmul.mubr.msk.bf16.vlgmr.msra.gmra.mxu1 %vm211_vm3, %v198_v38 }
 0x34b   :  { %v249_v40 = vpop.f32.mrf.mxu1 }
 0x34c   :  { %v250_v41 = vadd.f32 %v306_v39, %v249_v40 }
 0x34d   :  { %v333_v42 = vpop.f32.mrf.mxu1 }
 0x34e   :  { %256 = vmax.xlane.f32.xlu1 %v250_v41 }
 0x34f   :  { %v252_v43 = vpop.f32.mrf.mxu1 }
 0x350   :  { %v253_v44 = vadd.f32 %v306_v39, %v252_v43 }
 0x351   :  { %v334_v45 = vpop.f32.mrf.mxu1 }
 0x352   :  { %258 = vmax.xlane.f32.xlu0 %v253_v44 }
 0x3d7   :  { %v257_v46 = vpop.xlane.xlu1 %256 }
 0x3d8   :  { %v260_v47 = vsub.f32 %v250_v41, %v257_v46 }
 0x3da   :  { %v262_v48 = vmul.f32 1.442695, %v260_v47 }
 0x3db   :  { %v259_v49 = vpop.xlane.xlu0 %258 }
 0x3dc   :  { %364 = vpow2.f32 %v262_v48  ;;  %v261_v50 = vsub.f32 %v253_v44, %v259_v49 }
 0x3de   :  { %v264_v51 = vmul.f32 1.442695, %v261_v50 }
 0x3e0   :  { %366 = vpow2.f32 %v264_v51 }
 0x3e9   :  { %v365_v52 = vpop.eup %364 }
 0x3ea   :  { %266 = vadd.xlane.f32.xlu0 %v365_v52 }
 0x3ed   :  { %v367_v53 = vpop.eup %366 }
 0x3ee   :  { %268 = vadd.xlane.f32.xlu1 %v367_v53 }
 0x473   :  { %v267_v54 = vpop.xlane.xlu0 %266 }
 0x474   :  { %368 = vlog2.f32 %v267_v54 }
 0x477   :  { %v269_v55 = vpop.xlane.xlu1 %268 }
 0x478   :  { %370 = vlog2.f32 %v269_v55 }
 0x481   :  { %v369_v56 = vpop.eup %368 }
 0x482   :  { %v271_v57 = vmul.f32 0.6931472, %v369_v56 }
 0x484   :  { %v274_v58 = vsub.f32 %v260_v47, %v271_v57 }
 0x485   :  { %v371_v59 = vpop.eup %370 }
 0x486   :  { %276 = vst [vmem:[#allocation8] sm:$0xff] %v274_v58  ;;  %v273_v60 = vmul.f32 0.6931472, %v371_v59 }
 0x488   :  { %v275_v61 = vsub.f32 %v261_v50, %v273_v60 }
 0x48a   :  { %277 = vst [vmem:[#allocation8 + $0x8] sm:$0xff] %v275_v61 }
 0x48b   :  { %443 = shalt.err (!%p440_p5)
}
 0x48c   :  { %s467_s13 = smov 128   ;;  %s468_s14 = smov 8  }
 0x48d   :  { %289 = dma.vmem_to_hbm [thread:$0]  %s284_s11, 256, %s531_s5, [#allocation4], %s467_s13, %s467_s13, %s468_s14  }
 0x48e   :  { %456 = dma.done.wait [#allocation4], 256  }
 0x48f   :  { %457 = vsyncadd [#allocation4], 4294967040 }
 0x490   :  { %293 = vsyncpa [#allocation3], 1 }
 0x491   :  { %294 = vsyncpa [#allocation6], 1 }
 0x492   :  { %295 = vsyncpa [#allocation4], 1 }

</bundles_post_ra>
